<compile_context>
chip_gen: v7x
topology: tpu7x:2x2x1
jax: 0.10.0
libtpu: 0.0.40
codegen_flags: <defaults>
</compile_context>

<pallas_src>
import functools

import jax
import jax.numpy as jnp
from jax.experimental import pallas as pl
from jax.experimental.pallas import tpu as pltpu


def _apply_activation(x, pool_activation):
    if pool_activation == "tanh":
        return jnp.tanh(x)
    if pool_activation == "gelu":
        # PyTorch nn.GELU() default is the exact erf-based formulation.
        return jax.nn.gelu(x, approximate=False)
    return x  # identity for any other string, matching the PyTorch module


def _vmem_capacity_bytes():
    try:
        return int(pltpu.get_tpu_info().vmem_capacity_bytes)
    except Exception:
        return 64 << 20  # v7x worst case


def _vmem_limit(need_bytes):
    cap = _vmem_capacity_bytes()
    # Never below the largest scoped default (32 MiB on v6e, 16 MiB on v5e) so
    # small problems don't shrink the compiler's budget; never above physical
    # VMEM minus headroom (v7x only has 64 MiB per TensorCore).
    return int(min(max(need_bytes + (4 << 20), 32 << 20), cap - (8 << 20)))


def _batch_tile(B, cap=128):
    # >=2 batch tiles whenever B > 8 so dimension_semantics=("parallel", ...)
    # actually shards the grid across both TensorCores on v7x; tiles stay
    # sublane-aligned (multiple of 8) and capped for VMEM / MXU-M fill.
    if B <= 8:
        return B
    half = 8 * max(1, (B // 2) // 8)
    return min(half, cap)


def _resident_spec(block_shape, index_map, pipeline_mode):
    # Constant-index-map operands (weight / bias): optionally single-buffered.
    if pipeline_mode is None:
        return pl.BlockSpec(block_shape, index_map)
    return pl.BlockSpec(block_shape, index_map, pipeline_mode=pipeline_mode)


# ---------------------------------------------------------------------------
# CLS pooling: dense(hidden_states[:, 0]) — kernel sees only the [TB, H] rows.
# ---------------------------------------------------------------------------
def _cls_kernel(x_ref, w_ref, b_ref, out_ref, *, pool_activation):
    # Operands keep their storage dtype: bf16 inputs/weights take the native
    # bf16 -> f32-accumulate MXU path; f32 stays numerically identical.
    out = jnp.dot(x_ref[...], w_ref[...], preferred_element_type=jnp.float32)
    out = out + b_ref[...].astype(jnp.float32)
    out = _apply_activation(out, pool_activation)
    out_ref[...] = out.astype(out_ref.dtype)


# ---------------------------------------------------------------------------
# MEAN pooling: streamed seq reduction into a f32 VMEM accumulator; the dense
# layer + bias + activation only run on the final seq step.
# ---------------------------------------------------------------------------
def _mean_kernel(hs_ref, w_ref, b_ref, out_ref, acc_ref, *,
                 seq_len, seq_tile, pool_activation):
    s = pl.program_id(1)
    last = pl.num_programs(1) - 1

    @pl.when(s == 0)
    def _():
        acc_ref[...] = jnp.zeros_like(acc_ref)

    if seq_len % seq_tile == 0:
        # Steady state: fused cast+add reduction, no masking work.
        acc_ref[...] += jnp.sum(hs_ref[...], axis=1, dtype=jnp.float32)
    else:
        @pl.when(s != last)
        def _():
            acc_ref[...] += jnp.sum(hs_ref[...], axis=1, dtype=jnp.float32)

        @pl.when(s == last)
        def _():
            # Ragged tail: mask only on the final seq step.
            valid = seq_len - s * seq_tile
            row = jax.lax.broadcasted_iota(jnp.int32, (1, seq_tile, 1), 1)
            hs = jnp.where(row < valid, hs_ref[...], 0.0)
            acc_ref[...] += jnp.sum(hs, axis=1, dtype=jnp.float32)

    @pl.when(s == last)
    def _():
        pooled = acc_ref[...] * (1.0 / seq_len)                  # f32 mean
        # Cast down to the weight's storage dtype for the MXU (no-op for f32
        # weights; native bf16 matmul with f32 accumulation for bf16 weights).
        out = jnp.dot(pooled.astype(w_ref.dtype), w_ref[...],
                      preferred_element_type=jnp.float32)
        out = out + b_ref[...].astype(jnp.float32)
        out = _apply_activation(out, pool_activation)
        out_ref[...] = out.astype(out_ref.dtype)


def bert_pooler(hidden_states, weight, bias, *, pooling="MEAN",
                pool_activation="tanh"):
    """hidden_states: [B, S, H]; weight: [H, F] (pre-transposed vs. torch);
    bias: [F].  Returns [B, F] in hidden_states.dtype."""
    B, S, H = hidden_states.shape
    F = weight.shape[1]
    bias2d = bias.reshape(1, F)
    out_shape = jax.ShapeDtypeStruct((B, F), hidden_states.dtype)

    itemsize = hidden_states.dtype.itemsize
    # Conservative (double-buffered-everything) weight/bias footprint so the
    # vmem limit also covers the non-single-buffered fallback path.
    wb_bytes = 2 * (weight.size * weight.dtype.itemsize + F * bias.dtype.itemsize)

    if pooling == "CLS":
        # Slice token 0 in the wrapper: the kernel DMAs one H-contiguous row
        # per batch element instead of an 8-token slab (~8x fewer HBM bytes).
        cls_rows = hidden_states[:, 0, :]                        # [B, H]
        TB = _batch_tile(B, cap=256)                             # 256 fills the 2x256 MXU M
        grid = (pl.cdiv(B, TB),)
        need = 2 * TB * H * itemsize + wb_bytes + 2 * TB * F * itemsize
        kernel = functools.partial(_cls_kernel, pool_activation=pool_activation)

        def launch(resident_mode):
            return pl.pallas_call(
                kernel,
                out_shape=out_shape,
                grid=grid,
                in_specs=[
                    pl.BlockSpec((TB, H), lambda b: (b, 0)),         # token-0 rows
                    _resident_spec((H, F), lambda b: (0, 0), resident_mode),
                    _resident_spec((1, F), lambda b: (0, 0), resident_mode),
                ],
                out_specs=pl.BlockSpec((TB, F), lambda b: (b, 0)),
                compiler_params=pltpu.CompilerParams(
                    dimension_semantics=("parallel",),               # megacore on v7x
                    vmem_limit_bytes=_vmem_limit(need),
                ),
            )(cls_rows, weight, bias2d)

    elif pooling == "MEAN":
        TB = _batch_tile(B, cap=128)
        # Seq tile sized from actual VMEM: ~1/8 of physical per streamed buffer
        # (16 MiB on v5e/v6e, 8 MiB on v7x) -> the double-buffered input uses
        # ~1/4 of VMEM, leaving room for weight/bias/output/accumulator.
        per_buf = max(4 << 20, min(16 << 20, _vmem_capacity_bytes() // 8))
        rows = max(8, per_buf // (TB * H * itemsize))
        TS = S if rows >= S else (rows // 8) * 8                 # full S or multiple of 8
        grid = (pl.cdiv(B, TB), pl.cdiv(S, TS))
        need = (2 * TB * TS * H * itemsize + wb_bytes
                + 2 * TB * F * itemsize + TB * H * 4)
        kernel = functools.partial(_mean_kernel, seq_len=S, seq_tile=TS,
                                   pool_activation=pool_activation)

        def launch(resident_mode):
            return pl.pallas_call(
                kernel,
                out_shape=out_shape,
                grid=grid,
                in_specs=[
                    pl.BlockSpec((TB, TS, H), lambda b, s: (b, s, 0)),  # streamed seq tiles
                    _resident_spec((H, F), lambda b, s: (0, 0), resident_mode),
                    _resident_spec((1, F), lambda b, s: (0, 0), resident_mode),
                ],
                out_specs=pl.BlockSpec((TB, F), lambda b, s: (b, 0)),   # resident across s
                scratch_shapes=[pltpu.VMEM((TB, H), jnp.float32)],      # f32 accumulator
                compiler_params=pltpu.CompilerParams(
                    dimension_semantics=("parallel", "arbitrary"),
                    vmem_limit_bytes=_vmem_limit(need),
                ),
            )(hidden_states, weight, bias2d)

    else:
        raise ValueError(f"unsupported pooling: {pooling}")

    try:
        # Single-buffer the resident weight/bias (constant index maps): halves
        # their VMEM residency — matters most inside v7x's 64 MiB budget.
        return launch(pl.Buffered(1))
    except Exception:
        # Fallback for builds without single-buffer pipeline_mode support.
        return launch(None)


def _reference(hidden_states, weight, bias, pooling, pool_activation):
    if pooling == "CLS":
        pooled = hidden_states[:, 0]
    else:
        pooled = hidden_states.mean(axis=1)
    out = pooled @ weight + bias
    return _apply_activation(out, pool_activation)


if __name__ == "__main__":
    # Small shapes consistent with the module's forward:
    #   hidden_states: [batch=2, seq=8, hidden=32], final_size=32
    B, S, H, FINAL = 2, 8, 32, 32

    key = jax.random.PRNGKey(0)
    k_hs, k_w, k_b = jax.random.split(key, 3)

    hidden_states = jax.random.normal(k_hs, (B, S, H), dtype=jnp.float32)
    # Deterministic synthetic "Linear" parameters (not a checkpoint load).
    weight = jax.random.normal(k_w, (H, FINAL), dtype=jnp.float32) * 0.02
    bias = jax.random.normal(k_b, (FINAL,), dtype=jnp.float32) * 0.02

    ok = True
    for pooling in ("CLS", "MEAN"):
        for act in ("tanh", "gelu"):
            out = bert_pooler(
                hidden_states, weight, bias, pooling=pooling, pool_activation=act
            )
            out = jax.block_until_ready(out)
            ref = _reference(hidden_states, weight, bias, pooling, act)
            if not jnp.allclose(out, ref, atol=1e-5, rtol=1e-5):
                ok = False

    if not ok:
        raise SystemExit("kernel output mismatch vs reference")
    print("KERNEL_OK")
</pallas_src>

<mosaic_0001>
module attributes {stable_mosaic.version = 11 : i64} {
  func.func @_cls_kernel(%arg0: i32, %arg1: memref<2x32xf32, #tpu.memory_space<vmem>>, %arg2: memref<32x32xf32, #tpu.memory_space<vmem>>, %arg3: memref<1x32xf32, #tpu.memory_space<vmem>>, %arg4: memref<2x32xf32, #tpu.memory_space<vmem>>) attributes {dimension_semantics = [#tpu.dimension_semantics<parallel>], iteration_bounds = array<i64: 1>, scalar_prefetch = 0 : i64, scratch_operands = 0 : i64, tpu.core_type = #tpu.core_type<tc>, window_params = [{transform_indices = @transform_0, window_bounds = array<i64: 2, 32>}, {pipeline_mode = #tpu.pipeline_mode<synchronous>, transform_indices = @transform_1, window_bounds = array<i64: 32, 32>}, {pipeline_mode = #tpu.pipeline_mode<synchronous>, transform_indices = @transform_2, window_bounds = array<i64: 1, 32>}, {transform_indices = @transform_3, window_bounds = array<i64: 2, 32>}]} {
    %c0 = arith.constant 0 : index
    %c0_0 = arith.constant 0 : index
    %0 = vector.load %arg1[%c0, %c0_0] : memref<2x32xf32, #tpu.memory_space<vmem>>, vector<2x32xf32>
    %c0_1 = arith.constant 0 : index
    %c0_2 = arith.constant 0 : index
    %1 = vector.load %arg2[%c0_1, %c0_2] : memref<32x32xf32, #tpu.memory_space<vmem>>, vector<32x32xf32>
    %cst = arith.constant dense<0.000000e+00> : vector<2x32xf32>
    %2 = tpu.matmul %0, %1, %cst {dimension_numbers = #tpu.dot_dimension_numbers<[1], [0], [0], [1], [0, 0, 1, 1], [], []>} : vector<2x32xf32>, vector<32x32xf32>, vector<2x32xf32> -> vector<2x32xf32>
    %c0_3 = arith.constant 0 : index
    %c0_4 = arith.constant 0 : index
    %3 = vector.load %arg3[%c0_3, %c0_4] : memref<1x32xf32, #tpu.memory_space<vmem>>, vector<1x32xf32>
    %4 = vector.broadcast %3 : vector<1x32xf32> to vector<2x32xf32>
    %5 = arith.addf %2, %4 : vector<2x32xf32>
    %6 = math.tanh %5 : vector<2x32xf32>
    %c0_5 = arith.constant 0 : index
    %c0_6 = arith.constant 0 : index
    %7 = vector.load %arg4[%c0_5, %c0_6] : memref<2x32xf32, #tpu.memory_space<vmem>>, vector<2x32xf32>
    tpu.vector_store %arg4[%c0_5, %c0_6], %6 {strides = array<i32>} : memref<2x32xf32, #tpu.memory_space<vmem>>, vector<2x32xf32>,
    return
  }
  func.func @transform_0(%arg0: i32) -> (i32, i32) {
    %c0_i32 = arith.constant 0 : i32
    %c0_i32_0 = arith.constant 0 : i32
    return %arg0, %c0_i32 : i32, i32
  }
  func.func @transform_1(%arg0: i32) -> (i32, i32) {
    %c0_i32 = arith.constant 0 : i32
    %c0_i32_0 = arith.constant 0 : i32
    %c0_i32_1 = arith.constant 0 : i32
    return %c0_i32, %c0_i32_0 : i32, i32
  }
  func.func @transform_2(%arg0: i32) -> (i32, i32) {
    %c0_i32 = arith.constant 0 : i32
    %c0_i32_0 = arith.constant 0 : i32
    %c0_i32_1 = arith.constant 0 : i32
    return %c0_i32, %c0_i32_0 : i32, i32
  }
  func.func @transform_3(%arg0: i32) -> (i32, i32) {
    %c0_i32 = arith.constant 0 : i32
    %c0_i32_0 = arith.constant 0 : i32
    return %arg0, %c0_i32 : i32, i32
  }
}

module attributes {stable_mosaic.version = 11 : i64} {
  func.func @_cls_kernel(%arg0: i32, %arg1: memref<2x32xf32, #tpu.memory_space<vmem>>, %arg2: memref<32x32xf32, #tpu.memory_space<vmem>>, %arg3: memref<1x32xf32, #tpu.memory_space<vmem>>, %arg4: memref<2x32xf32, #tpu.memory_space<vmem>>) attributes {dimension_semantics = [#tpu.dimension_semantics<parallel>], iteration_bounds = array<i64: 1>, scalar_prefetch = 0 : i64, scratch_operands = 0 : i64, tpu.core_type = #tpu.core_type<tc>, window_params = [{transform_indices = @transform_0, window_bounds = array<i64: 2, 32>}, {pipeline_mode = #tpu.pipeline_mode<synchronous>, transform_indices = @transform_1, window_bounds = array<i64: 32, 32>}, {pipeline_mode = #tpu.pipeline_mode<synchronous>, transform_indices = @transform_2, window_bounds = array<i64: 1, 32>}, {transform_indices = @transform_3, window_bounds = array<i64: 2, 32>}]} {
    %c0 = arith.constant 0 : index
    %c0_0 = arith.constant 0 : index
    %0 = vector.load %arg1[%c0, %c0_0] : memref<2x32xf32, #tpu.memory_space<vmem>>, vector<2x32xf32>
    %c0_1 = arith.constant 0 : index
    %c0_2 = arith.constant 0 : index
    %1 = vector.load %arg2[%c0_1, %c0_2] : memref<32x32xf32, #tpu.memory_space<vmem>>, vector<32x32xf32>
    %cst = arith.constant dense<0.000000e+00> : vector<2x32xf32>
    %2 = tpu.matmul %0, %1, %cst {dimension_numbers = #tpu.dot_dimension_numbers<[1], [0], [0], [1], [0, 0, 1, 1], [], []>} : vector<2x32xf32>, vector<32x32xf32>, vector<2x32xf32> -> vector<2x32xf32>
    %c0_3 = arith.constant 0 : index
    %c0_4 = arith.constant 0 : index
    %3 = vector.load %arg3[%c0_3, %c0_4] : memref<1x32xf32, #tpu.memory_space<vmem>>, vector<1x32xf32>
    %4 = vector.broadcast %3 : vector<1x32xf32> to vector<2x32xf32>
    %5 = arith.addf %2, %4 : vector<2x32xf32>
    %6 = math.tanh %5 : vector<2x32xf32>
    %c0_5 = arith.constant 0 : index
    %c0_6 = arith.constant 0 : index
    %7 = vector.load %arg4[%c0_5, %c0_6] : memref<2x32xf32, #tpu.memory_space<vmem>>, vector<2x32xf32>
    tpu.vector_store %arg4[%c0_5, %c0_6], %6 {strides = array<i32>} : memref<2x32xf32, #tpu.memory_space<vmem>>, vector<2x32xf32>,
    return
  }
  func.func @transform_0(%arg0: i32) -> (i32, i32) {
    %c0_i32 = arith.constant 0 : i32
    %c0_i32_0 = arith.constant 0 : i32
    return %arg0, %c0_i32 : i32, i32
  }
  func.func @transform_1(%arg0: i32) -> (i32, i32) {
    %c0_i32 = arith.constant 0 : i32
    %c0_i32_0 = arith.constant 0 : i32
    %c0_i32_1 = arith.constant 0 : i32
    return %c0_i32, %c0_i32_0 : i32, i32
  }
  func.func @transform_2(%arg0: i32) -> (i32, i32) {
    %c0_i32 = arith.constant 0 : i32
    %c0_i32_0 = arith.constant 0 : i32
    %c0_i32_1 = arith.constant 0 : i32
    return %c0_i32, %c0_i32_0 : i32, i32
  }
  func.func @transform_3(%arg0: i32) -> (i32, i32) {
    %c0_i32 = arith.constant 0 : i32
    %c0_i32_0 = arith.constant 0 : i32
    return %arg0, %c0_i32 : i32, i32
  }
}

</mosaic_0001>

<bundles_post_ra>
// kernel: tpu_custom_call.1
= control target key start
LH: loop header
LB: loop body
LE: loop exit
PB: predicated region body
PF: predicated region fallthrough
CT: control target
= control target key end

     0   :  { %8 = vsyncpa [#allocation3], 0  ;;  %s326_s0 = inlined_call_operand.hbm [shape: f32[2,32], index: 0, kind: input, shape index: {}]   ;;  %s327_s1 = inlined_call_operand.hbm [shape: f32[32,32], index: 1, kind: input, shape index: {}]   ;;  %s328_s2 = inlined_call_operand.vmem [shape: f32[1,32], index: 2, kind: input, shape index: {}]   ;;  %s329_s3 = inlined_call_operand.hbm [shape: f32[2,32], index: 3, kind: output, shape index: {}]  }
   0x1   :  { %9 = vsyncpa [#allocation6], 0 }
   0x2   :  { %10 = vsyncpa [#allocation4], 0  ;;  %s252_s12 = smov [#allocation2]   ;;  %s253_s14 = smov [#allocation5]  }
   0x3   :  { %s17_s13 = sshll.u32 %s252_s12, 4  ;;  %s26_s15 = sshll.u32 %s253_s14, 4  ;;  %s18_s13 = int_to_ptr.vmem [resolvable:$true] %s17_s13  ;;  %s280_s15 = int_to_ptr.vmem [resolvable:$true] %s26_s15 }
   0x4   :  { %s180_s18 = scalar_lea.hbm %s326_s0, 32 }
   0x5   :  { %p181_p0 = scmp.ne.s32.totalorder %s326_s0, %s180_s18  ;;  %p184_p1 = scmp.lt.u32.totalorder %s180_s18, %s326_s0 }
   0x7   :  { %p186_p2 = pnand %p184_p1, %p181_p0 }
   0x9   :  { %189 = shalt.err (!%p186_p2)
}
   0xa   :  { %s190_s23 = scalar_lea.vmem %s18_s13, 32  ;;  %p195_p4 = scmp.lt.s32.totalorder %s18_s13, %s18_s13 }
   0xb   :  { %p191_p3 = scmp.ne.s32.totalorder %s18_s13, %s190_s23  ;;  %p196_p5 = scmp.lt.s32.totalorder %s190_s23, %s190_s23 }
   0xd   :  { %p197_p6 = por %p196_p5, %p195_p4 }
   0xf   :  { %p198_p7 = pnand %p197_p6, %p191_p3 }
  0x11   :  { %201 = shalt.err (!%p198_p7)
}
  0x12   :  { %20 = dma.hbm_to_vmem [thread:$0]  %s326_s0, 32, %s18_s13, [#allocation3]  }
  0x13   :  { %s202_s28 = scalar_lea.hbm %s327_s1, 512 }
  0x14   :  { %p203_p8 = scmp.ne.s32.totalorder %s327_s1, %s202_s28  ;;  %p206_p9 = scmp.lt.u32.totalorder %s202_s28, %s327_s1 }
  0x16   :  { %p208_p10 = pnand %p206_p9, %p203_p8 }
  0x18   :  { %211 = shalt.err (!%p208_p10)
}
  0x19   :  { %s212_s6 = scalar_lea.vmem %s280_s15, 512  ;;  %p217_p12 = scmp.lt.s32.totalorder %s280_s15, %s280_s15 }
  0x1a   :  { %p213_p11 = scmp.ne.s32.totalorder %s280_s15, %s212_s6  ;;  %p218_p13 = scmp.lt.s32.totalorder %s212_s6, %s212_s6 }
  0x1c   :  { %p219_p0 = por %p218_p13, %p217_p12 }
  0x1e   :  { %p220_p1 = pnand %p219_p0, %p213_p11 }
  0x20   :  { %223 = shalt.err (!%p220_p1)
}
  0x21   :  { %s254_s0 = smov 128   ;;  %s255_s7 = smov 8  }
  0x22   :  { %32 = dma.hbm_to_vmem [thread:$0]  %s327_s1, 512, %s280_s15, [#allocation6], %s254_s0, %s254_s0, %s255_s7  }
  0x23   :  { %246 = dma.done.wait [#allocation3], 32  }
  0x24   :  { %247 = vsyncadd [#allocation3], 4294967264 }
  0x25   :  { %248 = dma.done.wait [#allocation6], 512  }
  0x26   :  { %249 = vsyncadd [#allocation6], 4294966784  ;;  %v256_v0 = vmov 0.0|0.0   ;;  %vm257_vm0 = vmmov 0   ;;  %v258_v1 = vmov 0.0   ;;  %v42_v2 = vld [vmem:[#allocation5] sm:$0xff] }
  0x27   :  { %164 = vmatprep.subr.bf16.mxu0 %v256_v0  ;;  %161 = vmatprep.mubr.msk.f32.mxu0 %vm257_vm0, %v258_v1  ;;  %v43_v3 = vld [vmem:[#allocation5 + $0x8] sm:$0xff]  ;;  %v44_v4 = vld [vmem:[#allocation5 + $0x10] sm:$0xff]  ;;  %v45_v6 = vld [vmem:[#allocation5 + $0x18] sm:$0xff]  ;;  %vm53_vm1 = vcmask 261120   ;;  %s259_s11 = smov [#allocation7]   ;;  %vm128_vm2 = vcmask 254976  }
  0x28   :  { %v165_v5 = vpack.c.bf16 %v43_v3, %v42_v2  ;;  %v168_v7 = vpack.c.bf16 %v45_v6, %v44_v4  ;;  %v41_v8 = vld [vmem:[#allocation2] sm:$0x3]  ;;  %s136_s12 = sshll.u32 %s259_s11, 4  ;;  %s137_s12 = int_to_ptr.vmem [resolvable:$true] %s136_s12 }
  0x29   :  { %v146_v9 = vld [vmem:[%s328_s2] ss:$0 sm:$0xff]  ;;  %s224_s13 = scalar_lea.vmem %s137_s12, 32  ;;  %p229_p3 = scmp.lt.s32.totalorder %s137_s12, %s137_s12 }
  0x2a   :  { %166 = vmatpush3.bf16.msra.mxu0 %v165_v5  ;;  %p225_p2 = scmp.ne.s32.totalorder %s137_s12, %s224_s13  ;;  %p230_p4 = scmp.lt.s32.totalorder %s224_s13, %s224_s13 }
  0x2b   :  { %167 = vmatprep.subr.bf16.mxu0 %v256_v0 }
  0x2c   :  { %p231_p5 = por %p230_p4, %p229_p3 }
  0x2e   :  { %169 = vmatpush3.bf16.msra.mxu0 %v168_v7  ;;  %p232_p6 = pnand %p231_p5, %p225_p2 }
  0x31   :  { %162 = vmatmul.mubr.msk.f32.vlgmr.msra.gmra.mrb[0].mxu0 %vm53_vm1, %v41_v8 }
 0x104   :  { %v123_v10 = vpop.f32.mrb[0].mxu0 }
 0x105   :  { %v124_v11 = vadd.f32 %v146_v9, %v123_v10  ;;  %v163_v12 = vpop.f32.mrb[1].mxu0 }
 0x107   :  { %178 = vtanh.f32 %v124_v11 }
 0x111   :  { %v179_v13 = vpop.eup %178 }
 0x112   :  { %129 = vst.msk [vmem:[#allocation7] sm:$0x3] %vm128_vm2, %v179_v13 }
 0x113   :  { %235 = shalt.err (!%p232_p6)
}
 0x114   :  { %s236_s2 = scalar_lea.hbm %s329_s3, 32 }
 0x115   :  { %p237_p7 = scmp.ne.s32.totalorder %s329_s3, %s236_s2  ;;  %p240_p8 = scmp.lt.u32.totalorder %s236_s2, %s329_s3 }
 0x117   :  { %p242_p9 = pnand %p240_p8, %p237_p7 }
 0x119   :  { %245 = shalt.err (!%p242_p9)
}
 0x11a   :  { %139 = dma.vmem_to_hbm [thread:$0]  %s137_s12, 32, %s329_s3, [#allocation4]  }
 0x11b   :  { %250 = dma.done.wait [#allocation4], 32  }
 0x11c   :  { %251 = vsyncadd [#allocation4], 4294967264 }
 0x11d   :  { %143 = vsyncpa [#allocation3], 1 }
 0x11e   :  { %144 = vsyncpa [#allocation6], 1 }
 0x11f   :  { %145 = vsyncpa [#allocation4], 1 }

// kernel: tpu_custom_call.1
= control target key start
LH: loop header
LB: loop body
LE: loop exit
PB: predicated region body
PF: predicated region fallthrough
CT: control target
= control target key end

     0   :  { %8 = vsyncpa [#allocation3], 0  ;;  %s326_s0 = inlined_call_operand.hbm [shape: f32[2,32], index: 0, kind: input, shape index: {}]   ;;  %s327_s1 = inlined_call_operand.hbm [shape: f32[32,32], index: 1, kind: input, shape index: {}]   ;;  %s328_s2 = inlined_call_operand.vmem [shape: f32[1,32], index: 2, kind: input, shape index: {}]   ;;  %s329_s3 = inlined_call_operand.hbm [shape: f32[2,32], index: 3, kind: output, shape index: {}]  }
   0x1   :  { %9 = vsyncpa [#allocation6], 0 }
   0x2   :  { %10 = vsyncpa [#allocation4], 0  ;;  %s252_s12 = smov [#allocation2]   ;;  %s253_s14 = smov [#allocation5]  }
   0x3   :  { %s17_s13 = sshll.u32 %s252_s12, 4  ;;  %s26_s15 = sshll.u32 %s253_s14, 4  ;;  %s18_s13 = int_to_ptr.vmem [resolvable:$true] %s17_s13  ;;  %s280_s15 = int_to_ptr.vmem [resolvable:$true] %s26_s15 }
   0x4   :  { %s180_s18 = scalar_lea.hbm %s326_s0, 32 }
   0x5   :  { %p181_p0 = scmp.ne.s32.totalorder %s326_s0, %s180_s18  ;;  %p184_p1 = scmp.lt.u32.totalorder %s180_s18, %s326_s0 }
   0x7   :  { %p186_p2 = pnand %p184_p1, %p181_p0 }
   0x9   :  { %189 = shalt.err (!%p186_p2)
}
   0xa   :  { %s190_s23 = scalar_lea.vmem %s18_s13, 32  ;;  %p195_p4 = scmp.lt.s32.totalorder %s18_s13, %s18_s13 }
   0xb   :  { %p191_p3 = scmp.ne.s32.totalorder %s18_s13, %s190_s23  ;;  %p196_p5 = scmp.lt.s32.totalorder %s190_s23, %s190_s23 }
   0xd   :  { %p197_p6 = por %p196_p5, %p195_p4 }
   0xf   :  { %p198_p7 = pnand %p197_p6, %p191_p3 }
  0x11   :  { %201 = shalt.err (!%p198_p7)
}
  0x12   :  { %20 = dma.hbm_to_vmem [thread:$0]  %s326_s0, 32, %s18_s13, [#allocation3]  }
  0x13   :  { %s202_s28 = scalar_lea.hbm %s327_s1, 512 }
  0x14   :  { %p203_p8 = scmp.ne.s32.totalorder %s327_s1, %s202_s28  ;;  %p206_p9 = scmp.lt.u32.totalorder %s202_s28, %s327_s1 }
  0x16   :  { %p208_p10 = pnand %p206_p9, %p203_p8 }
  0x18   :  { %211 = shalt.err (!%p208_p10)
}
  0x19   :  { %s212_s6 = scalar_lea.vmem %s280_s15, 512  ;;  %p217_p12 = scmp.lt.s32.totalorder %s280_s15, %s280_s15 }
  0x1a   :  { %p213_p11 = scmp.ne.s32.totalorder %s280_s15, %s212_s6  ;;  %p218_p13 = scmp.lt.s32.totalorder %s212_s6, %s212_s6 }
  0x1c   :  { %p219_p0 = por %p218_p13, %p217_p12 }
  0x1e   :  { %p220_p1 = pnand %p219_p0, %p213_p11 }
  0x20   :  { %223 = shalt.err (!%p220_p1)
}
  0x21   :  { %s254_s0 = smov 128   ;;  %s255_s7 = smov 8  }
  0x22   :  { %32 = dma.hbm_to_vmem [thread:$0]  %s327_s1, 512, %s280_s15, [#allocation6], %s254_s0, %s254_s0, %s255_s7  }
  0x23   :  { %246 = dma.done.wait [#allocation3], 32  }
  0x24   :  { %247 = vsyncadd [#allocation3], 4294967264 }
  0x25   :  { %248 = dma.done.wait [#allocation6], 512  }
  0x26   :  { %249 = vsyncadd [#allocation6], 4294966784  ;;  %v256_v0 = vmov 0.0|0.0   ;;  %vm257_vm0 = vmmov 0   ;;  %v258_v1 = vmov 0.0   ;;  %v42_v2 = vld [vmem:[#allocation5] sm:$0xff] }
  0x27   :  { %164 = vmatprep.subr.bf16.mxu0 %v256_v0  ;;  %161 = vmatprep.mubr.msk.f32.mxu0 %vm257_vm0, %v258_v1  ;;  %v43_v3 = vld [vmem:[#allocation5 + $0x8] sm:$0xff]  ;;  %v44_v4 = vld [vmem:[#allocation5 + $0x10] sm:$0xff]  ;;  %v45_v6 = vld [vmem:[#allocation5 + $0x18] sm:$0xff]  ;;  %vm53_vm1 = vcmask 261120   ;;  %s259_s11 = smov [#allocation7]   ;;  %vm128_vm2 = vcmask 254976  }
  0x28   :  { %v165_v5 = vpack.c.bf16 %v43_v3, %v42_v2  ;;  %v168_v7 = vpack.c.bf16 %v45_v6, %v44_v4  ;;  %v41_v8 = vld [vmem:[#allocation2] sm:$0x3]  ;;  %s136_s12 = sshll.u32 %s259_s11, 4  ;;  %s137_s12 = int_to_ptr.vmem [resolvable:$true] %s136_s12 }
  0x29   :  { %v146_v9 = vld [vmem:[%s328_s2] ss:$0 sm:$0xff]  ;;  %s224_s13 = scalar_lea.vmem %s137_s12, 32  ;;  %p229_p3 = scmp.lt.s32.totalorder %s137_s12, %s137_s12 }
  0x2a   :  { %166 = vmatpush3.bf16.msra.mxu0 %v165_v5  ;;  %p225_p2 = scmp.ne.s32.totalorder %s137_s12, %s224_s13  ;;  %p230_p4 = scmp.lt.s32.totalorder %s224_s13, %s224_s13 }
  0x2b   :  { %167 = vmatprep.subr.bf16.mxu0 %v256_v0 }
  0x2c   :  { %p231_p5 = por %p230_p4, %p229_p3 }
  0x2e   :  { %169 = vmatpush3.bf16.msra.mxu0 %v168_v7  ;;  %p232_p6 = pnand %p231_p5, %p225_p2 }
  0x31   :  { %162 = vmatmul.mubr.msk.f32.vlgmr.msra.gmra.mrb[0].mxu0 %vm53_vm1, %v41_v8 }
 0x104   :  { %v123_v10 = vpop.f32.mrb[0].mxu0 }
 0x105   :  { %v124_v11 = vadd.f32 %v146_v9, %v123_v10  ;;  %v163_v12 = vpop.f32.mrb[1].mxu0 }
 0x107   :  { %178 = vtanh.f32 %v124_v11 }
 0x111   :  { %v179_v13 = vpop.eup %178 }
 0x112   :  { %129 = vst.msk [vmem:[#allocation7] sm:$0x3] %vm128_vm2, %v179_v13 }
 0x113   :  { %235 = shalt.err (!%p232_p6)
}
 0x114   :  { %s236_s2 = scalar_lea.hbm %s329_s3, 32 }
 0x115   :  { %p237_p7 = scmp.ne.s32.totalorder %s329_s3, %s236_s2  ;;  %p240_p8 = scmp.lt.u32.totalorder %s236_s2, %s329_s3 }
 0x117   :  { %p242_p9 = pnand %p240_p8, %p237_p7 }
 0x119   :  { %245 = shalt.err (!%p242_p9)
}
 0x11a   :  { %139 = dma.vmem_to_hbm [thread:$0]  %s137_s12, 32, %s329_s3, [#allocation4]  }
 0x11b   :  { %250 = dma.done.wait [#allocation4], 32  }
 0x11c   :  { %251 = vsyncadd [#allocation4], 4294967264 }
 0x11d   :  { %143 = vsyncpa [#allocation3], 1 }
 0x11e   :  { %144 = vsyncpa [#allocation6], 1 }
 0x11f   :  { %145 = vsyncpa [#allocation4], 1 }

</bundles_post_ra>
